<compile_context>
chip_gen: v7x
topology: tpu7x:2x2x1
jax: 0.10.0
libtpu: 0.0.40
codegen_flags: <defaults>
</compile_context>

<pallas_src>
import functools

import jax
import jax.numpy as jnp
from jax import lax
from jax.experimental import pallas as pl
from jax.experimental.pallas import tpu as pltpu


def _layernorm(z, g, b, eps):
    mu = jnp.mean(z, axis=-1, keepdims=True)
    var = jnp.mean((z - mu) ** 2, axis=-1, keepdims=True)
    return (z - mu) * lax.rsqrt(var + eps) * g + b


def block_kernel(T, C, H, eps, approx_recip,
                 x_ref, ln1g_ref, ln1b_ref,
                 wqkv_ref, wproj_ref, bproj_ref,
                 ln2g_ref, ln2b_ref,
                 w1_ref, b1_ref, w2_ref, b2_ref,
                 out_ref,
                 h1_ref, acc_ref):
    """One (batch b, head h) grid step.

    Refs (head/batch dims squeezed by BlockSpec):
      x_ref (T, C) f32, wqkv_ref (C, 3*hs) bf16, wproj_ref (hs, C) bf16,
      w1_ref (C, 4C) bf16, w2_ref (4C, C) bf16, LN params / biases f32,
      scratch h1_ref (T, C) f32, acc_ref (T, C) f32, out_ref (T, C).
    """
    hs = C // H
    h = pl.program_id(1)

    # ---- once per batch tile: LN1 and the attention-output accumulator ----
    @pl.when(h == 0)
    def _():
        h1_ref[...] = _layernorm(x_ref[...], ln1g_ref[...], ln1b_ref[...], eps)
        acc_ref[...] = jnp.zeros_like(acc_ref)

    # ---- this head's contribution ------------------------------------------
    # Fused per-head QKV matmul; the 1/sqrt(hs) score scale is already folded
    # into the Q columns of wqkv (wrapper-side).
    qkv = jnp.dot(h1_ref[...].astype(jnp.bfloat16), wqkv_ref[...],
                  preferred_element_type=jnp.float32)              # (T, 3*hs)
    q = qkv[:, 0 * hs:1 * hs].astype(jnp.bfloat16)
    k = qkv[:, 1 * hs:2 * hs].astype(jnp.bfloat16)
    v = qkv[:, 2 * hs:3 * hs].astype(jnp.bfloat16)

    # Scores q @ k^T without an explicit transpose (contract the last dims).
    s = lax.dot_general(q, k, (((1,), (1,)), ((), ())),
                        preferred_element_type=jnp.float32)        # (T, T)

    row = lax.broadcasted_iota(jnp.int32, (T, T), 0)
    col = lax.broadcasted_iota(jnp.int32, (T, T), 1)
    s = jnp.where(row >= col, s, -1e30)     # finite mask: no inf-inf NaN hazard
    s = s - jnp.max(s, axis=-1, keepdims=True)
    p = jnp.exp(s)                          # f32 softmax math on every gen
    denom = jnp.sum(p, axis=-1, keepdims=True)
    if approx_recip:
        p = p * pl.reciprocal(denom, approx=True)   # EUP slot, otherwise idle
    else:
        p = p / denom
    # attention dropout: identity (eval mode)

    o = jnp.dot(p.astype(jnp.bfloat16), v,
                preferred_element_type=jnp.float32)                # (T, hs)

    # Head merge done algebraically: accumulate o_h @ Wproj_h over the head
    # grid axis (no concat / stack relayouts).
    acc_ref[...] += jnp.dot(o.astype(jnp.bfloat16), wproj_ref[...],
                            preferred_element_type=jnp.float32)    # (T, C)

    # ---- after the last head: residual, LN2, MLP, second residual ----------
    @pl.when(h == H - 1)
    def _():
        x = x_ref[...]
        x1 = x + acc_ref[...] + bproj_ref[...]       # proj dropout: identity
        h2 = _layernorm(x1, ln2g_ref[...], ln2b_ref[...], eps)
        f = jnp.dot(h2.astype(jnp.bfloat16), w1_ref[...],
                    preferred_element_type=jnp.float32) + b1_ref[...]
        f = jnp.maximum(f, 0.0)
        f = jnp.dot(f.astype(jnp.bfloat16), w2_ref[...],
                    preferred_element_type=jnp.float32) + b2_ref[...]
        # MLP dropout: identity (eval mode)
        out_ref[...] = (x1 + f).astype(out_ref.dtype)


def _vmem_limit_bytes(B, T, C, H):
    """VMEM budget from actual tile math (instead of a fixed cap)."""
    hs = C // H
    f32, bf16 = 4, 2
    blocks = (
        T * C * f32                 # x tile
        + T * C * f32               # out tile
        + C * 3 * hs * bf16         # per-head fused QKV weight tile
        + hs * C * bf16             # per-head proj weight tile
        + 4 * C * f32               # ln1/ln2 gains + biases
        + 2 * C * f32               # bproj, b2
        + C * 4 * C * bf16          # w1
        + 4 * C * f32               # b1
        + 4 * C * C * bf16          # w2
    )
    scratch = 2 * T * C * f32       # LN1 + attention accumulator
    need = 2 * blocks + scratch     # x2: double-buffered pipeline copies
    budget = 2 * need + (8 << 20)   # compiler temporaries / headroom
    return int(min(max(budget, 16 << 20), 100 << 20))


def _cost_estimate(B, T, C, H):
    hs = C // H
    flops = 2 * B * T * C * 3 * C          # fused QKV
    flops += 2 * 2 * B * H * T * T * hs    # scores + P@V
    flops += 2 * B * T * C * C             # output projection
    flops += 2 * 2 * B * T * C * 4 * C     # MLP
    transcendentals = B * H * T * T + 4 * B * T     # exp + rsqrt/reciprocals
    bytes_accessed = (
        2 * B * T * C * 4                           # x in + out (f32)
        + (3 * C * C + C * C + 8 * C * C) * 2       # bf16 weights
        + 16 * C * 4                                # small f32 params
    )
    return pl.CostEstimate(flops=int(flops),
                           transcendentals=int(transcendentals),
                           bytes_accessed=int(bytes_accessed))


def transformer_block(x, params, *, num_heads, eps=1e-5, approx_recip=True):
    B, T, C = x.shape
    (ln1g, ln1b, wq, wk, wv, wproj, bproj,
     ln2g, ln2b, w1, b1, w2, b2) = params
    H = num_heads
    assert C % H == 0
    hs = C // H

    # ---- wrapper-side (free) weight prep ----
    # Per-head fused QKV weights with heads as a LEADING dim: (H, C, 3*hs).
    # The 1/sqrt(hs) score scale is folded into the Q columns.
    wq_h = (wq * (hs ** -0.5)).reshape(C, H, hs)
    wk_h = wk.reshape(C, H, hs)
    wv_h = wv.reshape(C, H, hs)
    wqkv_heads = jnp.transpose(
        jnp.concatenate([wq_h, wk_h, wv_h], axis=-1), (1, 0, 2)
    ).astype(jnp.bfloat16)                                       # (H, C, 3*hs)
    wproj_heads = wproj.reshape(H, hs, C).astype(jnp.bfloat16)   # (H, hs, C)
    w1_b = w1.astype(jnp.bfloat16)
    w2_b = w2.astype(jnp.bfloat16)

    kernel = functools.partial(block_kernel, T, C, H, eps, approx_recip)

    out = pl.pallas_call(
        kernel,
        out_shape=jax.ShapeDtypeStruct((B, T, C), x.dtype),
        grid_spec=pltpu.PrefetchScalarGridSpec(
            num_scalar_prefetch=0,
            grid=(B, H),   # batch: parallel (megacore), heads: trailing reduction
            in_specs=[
                pl.BlockSpec((None, T, C), lambda b, h: (b, 0, 0)),        # x
                pl.BlockSpec((1, C), lambda b, h: (0, 0)),                 # ln1g
                pl.BlockSpec((1, C), lambda b, h: (0, 0)),                 # ln1b
                pl.BlockSpec((None, C, 3 * hs), lambda b, h: (h, 0, 0)),   # wqkv[h]
                pl.BlockSpec((None, hs, C), lambda b, h: (h, 0, 0)),       # wproj[h]
                pl.BlockSpec((1, C), lambda b, h: (0, 0)),                 # bproj
                pl.BlockSpec((1, C), lambda b, h: (0, 0)),                 # ln2g
                pl.BlockSpec((1, C), lambda b, h: (0, 0)),                 # ln2b
                pl.BlockSpec((C, 4 * C), lambda b, h: (0, 0)),             # w1
                pl.BlockSpec((1, 4 * C), lambda b, h: (0, 0)),             # b1
                pl.BlockSpec((4 * C, C), lambda b, h: (0, 0)),             # w2
                pl.BlockSpec((1, C), lambda b, h: (0, 0)),                 # b2
            ],
            out_specs=pl.BlockSpec((None, T, C), lambda b, h: (b, 0, 0)),
            scratch_shapes=[
                pltpu.VMEM((T, C), jnp.float32),   # LN1(x), computed once per b
                pltpu.VMEM((T, C), jnp.float32),   # attention-output accumulator
            ],
        ),
        compiler_params=pltpu.CompilerParams(
            dimension_semantics=("parallel", "arbitrary"),
            vmem_limit_bytes=_vmem_limit_bytes(B, T, C, H),
        ),
        cost_estimate=_cost_estimate(B, T, C, H),
    )(x, ln1g, ln1b, wqkv_heads, wproj_heads, bproj,
      ln2g, ln2b, w1_b, b1, w2_b, b2)
    return out


def reference_block(x, params, *, num_heads, eps=1e-5):
    """Plain-JAX reference replicating the PyTorch forward (eval mode, f32)."""
    (ln1g, ln1b, wq, wk, wv, wproj, bproj,
     ln2g, ln2b, w1, b1, w2, b2) = params
    B, T, C = x.shape
    hs = C // num_heads

    def ln(z, g, b):
        mu = z.mean(-1, keepdims=True)
        var = ((z - mu) ** 2).mean(-1, keepdims=True)
        return (z - mu) / jnp.sqrt(var + eps) * g + b

    h1 = ln(x, ln1g, ln1b)
    q = (h1 @ wq).reshape(B, T, num_heads, hs).transpose(0, 2, 1, 3)
    k = (h1 @ wk).reshape(B, T, num_heads, hs).transpose(0, 2, 1, 3)
    v = (h1 @ wv).reshape(B, T, num_heads, hs).transpose(0, 2, 1, 3)
    wei = jnp.einsum("bhtd,bhsd->bhts", q, k) * hs ** -0.5
    mask = jnp.tril(jnp.ones((T, T), bool))
    wei = jnp.where(mask, wei, -jnp.inf)
    wei = jax.nn.softmax(wei, axis=-1)
    o = jnp.einsum("bhts,bhsd->bhtd", wei, v)
    o = o.transpose(0, 2, 1, 3).reshape(B, T, C)
    sa = o @ wproj + bproj
    x1 = x + sa
    h2 = ln(x1, ln2g, ln2b)
    f = jnp.maximum(h2 @ w1 + b1, 0.0) @ w2 + b2
    return x1 + f


def make_params(key, n_embd):
    C = n_embd
    ks = jax.random.split(key, 8)
    s = 0.02
    ln1g = jnp.ones((1, C), jnp.float32)
    ln1b = jnp.zeros((1, C), jnp.float32)
    ln2g = jnp.ones((1, C), jnp.float32)
    ln2b = jnp.zeros((1, C), jnp.float32)
    wq = s * jax.random.normal(ks[0], (C, C), jnp.float32)
    wk = s * jax.random.normal(ks[1], (C, C), jnp.float32)
    wv = s * jax.random.normal(ks[2], (C, C), jnp.float32)
    wproj = s * jax.random.normal(ks[3], (C, C), jnp.float32)
    bproj = s * jax.random.normal(ks[4], (1, C), jnp.float32)
    w1 = s * jax.random.normal(ks[5], (C, 4 * C), jnp.float32)
    b1 = jnp.zeros((1, 4 * C), jnp.float32)
    w2 = s * jax.random.normal(ks[6], (4 * C, C), jnp.float32)
    b2 = jnp.zeros((1, C), jnp.float32)
    return (ln1g, ln1b, wq, wk, wv, wproj, bproj,
            ln2g, ln2b, w1, b1, w2, b2)


if __name__ == "__main__":
    B, T, n_embd, num_heads = 2, 8, 32, 4   # block_size == T

    key = jax.random.PRNGKey(0)
    kx, kp = jax.random.split(key)
    x = jax.random.normal(kx, (B, T, n_embd), jnp.float32)
    params = make_params(kp, n_embd)

    out = transformer_block(x, params, num_heads=num_heads)
    out = jax.block_until_ready(out)

    ref = reference_block(x, params, num_heads=num_heads)
    assert out.shape == (B, T, n_embd)
    # Tolerance reflects the two deliberate deviations from the f32 reference:
    # bf16 matmul inputs (f32 accumulation) and the EUP approximate reciprocal
    # in the softmax denominator.  Structural bugs (mask, head mapping,
    # residuals) would produce O(1) errors, far above 2e-2.
    assert jnp.allclose(out, ref, atol=2e-2, rtol=2e-2), "mismatch vs reference"

    print("KERNEL_OK")
</pallas_src>

<mosaic_0001>
module attributes {stable_mosaic.version = 11 : i64} {
  func.func @block_kernel(%arg0: i32, %arg1: i32, %arg2: memref<1x8x32xf32, #tpu.memory_space<vmem>>, %arg3: memref<1x32xf32, #tpu.memory_space<vmem>>, %arg4: memref<1x32xf32, #tpu.memory_space<vmem>>, %arg5: memref<1x32x24xbf16, #tpu.memory_space<vmem>>, %arg6: memref<1x8x32xbf16, #tpu.memory_space<vmem>>, %arg7: memref<1x32xf32, #tpu.memory_space<vmem>>, %arg8: memref<1x32xf32, #tpu.memory_space<vmem>>, %arg9: memref<1x32xf32, #tpu.memory_space<vmem>>, %arg10: memref<32x128xbf16, #tpu.memory_space<vmem>>, %arg11: memref<1x128xf32, #tpu.memory_space<vmem>>, %arg12: memref<128x32xbf16, #tpu.memory_space<vmem>>, %arg13: memref<1x32xf32, #tpu.memory_space<vmem>>, %arg14: memref<1x8x32xf32, #tpu.memory_space<vmem>>, %arg15: memref<8x32xf32, #tpu.memory_space<vmem>>, %arg16: memref<8x32xf32, #tpu.memory_space<vmem>>) attributes {dimension_semantics = [#tpu.dimension_semantics<parallel>, #tpu.dimension_semantics<arbitrary>], iteration_bounds = array<i64: 2, 4>, scalar_prefetch = 0 : i64, scratch_operands = 2 : i64, tpu.core_type = #tpu.core_type<tc>, window_params = [{transform_indices = @transform_0, window_bounds = array<i64: 1, 8, 32>}, {pipeline_mode = #tpu.pipeline_mode<synchronous>, transform_indices = @transform_1, window_bounds = array<i64: 1, 32>}, {pipeline_mode = #tpu.pipeline_mode<synchronous>, transform_indices = @transform_2, window_bounds = array<i64: 1, 32>}, {transform_indices = @transform_3, window_bounds = array<i64: 1, 32, 24>}, {transform_indices = @transform_4, window_bounds = array<i64: 1, 8, 32>}, {pipeline_mode = #tpu.pipeline_mode<synchronous>, transform_indices = @transform_5, window_bounds = array<i64: 1, 32>}, {pipeline_mode = #tpu.pipeline_mode<synchronous>, transform_indices = @transform_6, window_bounds = array<i64: 1, 32>}, {pipeline_mode = #tpu.pipeline_mode<synchronous>, transform_indices = @transform_7, window_bounds = array<i64: 1, 32>}, {pipeline_mode = #tpu.pipeline_mode<synchronous>, transform_indices = @transform_8, window_bounds = array<i64: 32, 128>}, {pipeline_mode = #tpu.pipeline_mode<synchronous>, transform_indices = @transform_9, window_bounds = array<i64: 1, 128>}, {pipeline_mode = #tpu.pipeline_mode<synchronous>, transform_indices = @transform_10, window_bounds = array<i64: 128, 32>}, {pipeline_mode = #tpu.pipeline_mode<synchronous>, transform_indices = @transform_11, window_bounds = array<i64: 1, 32>}, {transform_indices = @transform_12, window_bounds = array<i64: 1, 8, 32>}]} {
    %c0_i32 = arith.constant 0 : i32
    %0 = arith.cmpi eq, %arg1, %c0_i32 : i32
    %1 = arith.extui %0 : i1 to i32
    %c0_i32_0 = arith.constant 0 : i32
    %2 = arith.cmpi ne, %1, %c0_i32_0 : i32
    scf.if %2 {
      %c0_19 = arith.constant 0 : index
      %c0_20 = arith.constant 0 : index
      %c0_21 = arith.constant 0 : index
      %42 = vector.load %arg2[%c0_19, %c0_20, %c0_21] : memref<1x8x32xf32, #tpu.memory_space<vmem>>, vector<1x8x32xf32>
      %43 = vector.shape_cast %42 : vector<1x8x32xf32> to vector<8x32xf32>
      %c0_22 = arith.constant 0 : index
      %c0_23 = arith.constant 0 : index
      %44 = vector.load %arg3[%c0_22, %c0_23] : memref<1x32xf32, #tpu.memory_space<vmem>>, vector<1x32xf32>
      %c0_24 = arith.constant 0 : index
      %c0_25 = arith.constant 0 : index
      %45 = vector.load %arg4[%c0_24, %c0_25] : memref<1x32xf32, #tpu.memory_space<vmem>>, vector<1x32xf32>
      %cst_26 = arith.constant dense<0.000000e+00> : vector<8xf32>
      %46 = vector.multi_reduction <add>, %43, %cst_26 [1] : vector<8x32xf32> to vector<8xf32>
      %47 = vector.shape_cast %46 : vector<8xf32> to vector<8x1xf32>
      %cst_27 = arith.constant 3.200000e+01 : f32
      %48 = vector.broadcast %cst_27 : f32 to vector<8x1xf32>
      %49 = arith.divf %47, %48 : vector<8x1xf32>
      %50 = vector.broadcast %49 : vector<8x1xf32> to vector<8x32xf32>
      %51 = arith.subf %43, %50 : vector<8x32xf32>
      %52 = arith.mulf %51, %51 : vector<8x32xf32>
      %cst_28 = arith.constant dense<0.000000e+00> : vector<8xf32>
      %53 = vector.multi_reduction <add>, %52, %cst_28 [1] : vector<8x32xf32> to vector<8xf32>
      %54 = vector.shape_cast %53 : vector<8xf32> to vector<8x1xf32>
      %cst_29 = arith.constant 3.200000e+01 : f32
      %55 = vector.broadcast %cst_29 : f32 to vector<8x1xf32>
      %56 = arith.divf %54, %55 : vector<8x1xf32>
      %57 = vector.broadcast %49 : vector<8x1xf32> to vector<8x32xf32>
      %58 = arith.subf %43, %57 : vector<8x32xf32>
      %cst_30 = arith.constant 9.99999974E-6 : f32
      %59 = vector.broadcast %cst_30 : f32 to vector<8x1xf32>
      %60 = arith.addf %56, %59 : vector<8x1xf32>
      %61 = math.rsqrt %60 : vector<8x1xf32>
      %62 = vector.broadcast %61 : vector<8x1xf32> to vector<8x32xf32>
      %63 = arith.mulf %58, %62 : vector<8x32xf32>
      %64 = vector.broadcast %44 : vector<1x32xf32> to vector<8x32xf32>
      %65 = arith.mulf %63, %64 : vector<8x32xf32>
      %66 = vector.broadcast %45 : vector<1x32xf32> to vector<8x32xf32>
      %67 = arith.addf %65, %66 : vector<8x32xf32>
      %c0_31 = arith.constant 0 : index
      %c0_32 = arith.constant 0 : index
      %68 = vector.load %arg15[%c0_31, %c0_32] : memref<8x32xf32, #tpu.memory_space<vmem>>, vector<8x32xf32>
      tpu.vector_store %arg15[%c0_31, %c0_32], %67 {strides = array<i32>} : memref<8x32xf32, #tpu.memory_space<vmem>>, vector<8x32xf32>,
      %cst_33 = arith.constant 0.000000e+00 : f32
      %69 = vector.broadcast %cst_33 : f32 to vector<8x32xf32>
      %c0_34 = arith.constant 0 : index
      %c0_35 = arith.constant 0 : index
      %70 = vector.load %arg16[%c0_34, %c0_35] : memref<8x32xf32, #tpu.memory_space<vmem>>, vector<8x32xf32>
      tpu.vector_store %arg16[%c0_34, %c0_35], %69 {strides = array<i32>} : memref<8x32xf32, #tpu.memory_space<vmem>>, vector<8x32xf32>,
    } else {
    }
    %c0 = arith.constant 0 : index
    %c0_1 = arith.constant 0 : index
    %3 = vector.load %arg15[%c0, %c0_1] : memref<8x32xf32, #tpu.memory_space<vmem>>, vector<8x32xf32>
    %4 = arith.truncf %3 : vector<8x32xf32> to vector<8x32xbf16>
    %c0_2 = arith.constant 0 : index
    %c0_3 = arith.constant 0 : index
    %c0_4 = arith.constant 0 : index
    %5 = vector.load %arg5[%c0_2, %c0_3, %c0_4] : memref<1x32x24xbf16, #tpu.memory_space<vmem>>, vector<1x32x24xbf16>
    %6 = vector.shape_cast %5 : vector<1x32x24xbf16> to vector<32x24xbf16>
    %cst = arith.constant dense<0.000000e+00> : vector<8x24xf32>
    %7 = tpu.matmul %4, %6, %cst {dimension_numbers = #tpu.dot_dimension_numbers<[1], [0], [0], [1], [0, 0, 1, 1], [], []>} : vector<8x32xbf16>, vector<32x24xbf16>, vector<8x24xf32> -> vector<8x24xf32>
    %8 = vector.extract_strided_slice %7 {offsets = [0, 0], sizes = [8, 8], strides = [1, 1]} : vector<8x24xf32> to vector<8x8xf32>
    %9 = arith.truncf %8 : vector<8x8xf32> to vector<8x8xbf16>
    %10 = vector.extract_strided_slice %7 {offsets = [0, 8], sizes = [8, 8], strides = [1, 1]} : vector<8x24xf32> to vector<8x8xf32>
    %11 = arith.truncf %10 : vector<8x8xf32> to vector<8x8xbf16>
    %12 = vector.extract_strided_slice %7 {offsets = [0, 16], sizes = [8, 8], strides = [1, 1]} : vector<8x24xf32> to vector<8x8xf32>
    %13 = arith.truncf %12 : vector<8x8xf32> to vector<8x8xbf16>
    %cst_5 = arith.constant dense<0.000000e+00> : vector<8x8xf32>
    %14 = tpu.matmul %9, %11, %cst_5 {dimension_numbers = #tpu.dot_dimension_numbers<[1], [1], [0], [0], [0, 0, 1, 0], [], []>} : vector<8x8xbf16>, vector<8x8xbf16>, vector<8x8xf32> -> vector<8x8xf32>
    %15 = tpu.iota {dimensions = array<i32: 0>} : vector<8x8xi32>
    %16 = tpu.iota {dimensions = array<i32: 1>} : vector<8x8xi32>
    %17 = arith.cmpi sge, %15, %16 : vector<8x8xi32>
    %cst_6 = arith.constant -1.000000e+30 : f32
    %18 = vector.broadcast %cst_6 : f32 to vector<8x8xf32>
    %19 = arith.select %17, %14, %18 : vector<8x8xi1>, vector<8x8xf32>
    %cst_7 = arith.constant dense<0xFF800000> : vector<8xf32>
    %20 = vector.multi_reduction <maximumf>, %19, %cst_7 [1] : vector<8x8xf32> to vector<8xf32>
    %21 = vector.shape_cast %20 : vector<8xf32> to vector<8x1xf32>
    %22 = vector.broadcast %21 : vector<8x1xf32> to vector<8x8xf32>
    %23 = arith.subf %19, %22 : vector<8x8xf32>
    %24 = math.exp %23 : vector<8x8xf32>
    %cst_8 = arith.constant dense<0.000000e+00> : vector<8xf32>
    %25 = vector.multi_reduction <add>, %24, %cst_8 [1] : vector<8x8xf32> to vector<8xf32>
    %26 = vector.shape_cast %25 : vector<8xf32> to vector<8x1xf32>
    %27 = tpu.reciprocal %26 {approx = true} : vector<8x1xf32> -> vector<8x1xf32>
    %28 = vector.broadcast %27 : vector<8x1xf32> to vector<8x8xf32>
    %29 = arith.mulf %24, %28 : vector<8x8xf32>
    %30 = arith.truncf %29 : vector<8x8xf32> to vector<8x8xbf16>
    %cst_9 = arith.constant dense<0.000000e+00> : vector<8x8xf32>
    %31 = tpu.matmul %30, %13, %cst_9 {dimension_numbers = #tpu.dot_dimension_numbers<[1], [0], [0], [1], [0, 0, 1, 1], [], []>} : vector<8x8xbf16>, vector<8x8xbf16>, vector<8x8xf32> -> vector<8x8xf32>
    %c0_10 = arith.constant 0 : index
    %c0_11 = arith.constant 0 : index
    %32 = vector.load %arg16[%c0_10, %c0_11] : memref<8x32xf32, #tpu.memory_space<vmem>>, vector<8x32xf32>
    %33 = arith.truncf %31 : vector<8x8xf32> to vector<8x8xbf16>
    %c0_12 = arith.constant 0 : index
    %c0_13 = arith.constant 0 : index
    %c0_14 = arith.constant 0 : index
    %34 = vector.load %arg6[%c0_12, %c0_13, %c0_14] : memref<1x8x32xbf16, #tpu.memory_space<vmem>>, vector<1x8x32xbf16>
    %35 = vector.shape_cast %34 : vector<1x8x32xbf16> to vector<8x32xbf16>
    %cst_15 = arith.constant dense<0.000000e+00> : vector<8x32xf32>
    %36 = tpu.matmul %33, %35, %cst_15 {dimension_numbers = #tpu.dot_dimension_numbers<[1], [0], [0], [1], [0, 0, 1, 1], [], []>} : vector<8x8xbf16>, vector<8x32xbf16>, vector<8x32xf32> -> vector<8x32xf32>
    %37 = arith.addf %32, %36 : vector<8x32xf32>
    %c0_16 = arith.constant 0 : index
    %c0_17 = arith.constant 0 : index
    %38 = vector.load %arg16[%c0_16, %c0_17] : memref<8x32xf32, #tpu.memory_space<vmem>>, vector<8x32xf32>
    tpu.vector_store %arg16[%c0_16, %c0_17], %37 {strides = array<i32>} : memref<8x32xf32, #tpu.memory_space<vmem>>, vector<8x32xf32>,
    %c3_i32 = arith.constant 3 : i32
    %39 = arith.cmpi eq, %arg1, %c3_i32 : i32
    %40 = arith.extui %39 : i1 to i32
    %c0_i32_18 = arith.constant 0 : i32
    %41 = arith.cmpi ne, %40, %c0_i32_18 : i32
    scf.if %41 {
      %c0_19 = arith.constant 0 : index
      %c0_20 = arith.constant 0 : index
      %c0_21 = arith.constant 0 : index
      %42 = vector.load %arg2[%c0_19, %c0_20, %c0_21] : memref<1x8x32xf32, #tpu.memory_space<vmem>>, vector<1x8x32xf32>
      %43 = vector.shape_cast %42 : vector<1x8x32xf32> to vector<8x32xf32>
      %c0_22 = arith.constant 0 : index
      %c0_23 = arith.constant 0 : index
      %44 = vector.load %arg16[%c0_22, %c0_23] : memref<8x32xf32, #tpu.memory_space<vmem>>, vector<8x32xf32>
      %45 = arith.addf %43, %44 : vector<8x32xf32>
      %c0_24 = arith.constant 0 : index
      %c0_25 = arith.constant 0 : index
      %46 = vector.load %arg7[%c0_24, %c0_25] : memref<1x32xf32, #tpu.memory_space<vmem>>, vector<1x32xf32>
      %47 = vector.broadcast %46 : vector<1x32xf32> to vector<8x32xf32>
      %48 = arith.addf %45, %47 : vector<8x32xf32>
      %c0_26 = arith.constant 0 : index
      %c0_27 = arith.constant 0 : index
      %49 = vector.load %arg8[%c0_26, %c0_27] : memref<1x32xf32, #tpu.memory_space<vmem>>, vector<1x32xf32>
      %c0_28 = arith.constant 0 : index
      %c0_29 = arith.constant 0 : index
      %50 = vector.load %arg9[%c0_28, %c0_29] : memref<1x32xf32, #tpu.memory_space<vmem>>, vector<1x32xf32>
      %cst_30 = arith.constant dense<0.000000e+00> : vector<8xf32>
      %51 = vector.multi_reduction <add>, %48, %cst_30 [1] : vector<8x32xf32> to vector<8xf32>
      %52 = vector.shape_cast %51 : vector<8xf32> to vector<8x1xf32>
      %cst_31 = arith.constant 3.200000e+01 : f32
      %53 = vector.broadcast %cst_31 : f32 to vector<8x1xf32>
      %54 = arith.divf %52, %53 : vector<8x1xf32>
      %55 = vector.broadcast %54 : vector<8x1xf32> to vector<8x32xf32>
      %56 = arith.subf %48, %55 : vector<8x32xf32>
      %57 = arith.mulf %56, %56 : vector<8x32xf32>
      %cst_32 = arith.constant dense<0.000000e+00> : vector<8xf32>
      %58 = vector.multi_reduction <add>, %57, %cst_32 [1] : vector<8x32xf32> to vector<8xf32>
      %59 = vector.shape_cast %58 : vector<8xf32> to vector<8x1xf32>
      %cst_33 = arith.constant 3.200000e+01 : f32
      %60 = vector.broadcast %cst_33 : f32 to vector<8x1xf32>
      %61 = arith.divf %59, %60 : vector<8x1xf32>
      %62 = vector.broadcast %54 : vector<8x1xf32> to vector<8x32xf32>
      %63 = arith.subf %48, %62 : vector<8x32xf32>
      %cst_34 = arith.constant 9.99999974E-6 : f32
      %64 = vector.broadcast %cst_34 : f32 to vector<8x1xf32>
      %65 = arith.addf %61, %64 : vector<8x1xf32>
      %66 = math.rsqrt %65 : vector<8x1xf32>
      %67 = vector.broadcast %66 : vector<8x1xf32> to vector<8x32xf32>
      %68 = arith.mulf %63, %67 : vector<8x32xf32>
      %69 = vector.broadcast %49 : vector<1x32xf32> to vector<8x32xf32>
      %70 = arith.mulf %68, %69 : vector<8x32xf32>
      %71 = vector.broadcast %50 : vector<1x32xf32> to vector<8x32xf32>
      %72 = arith.addf %70, %71 : vector<8x32xf32>
      %73 = arith.truncf %72 : vector<8x32xf32> to vector<8x32xbf16>
      %c0_35 = arith.constant 0 : index
      %c0_36 = arith.constant 0 : index
      %74 = vector.load %arg10[%c0_35, %c0_36] : memref<32x128xbf16, #tpu.memory_space<vmem>>, vector<32x128xbf16>
      %cst_37 = arith.constant dense<0.000000e+00> : vector<8x128xf32>
      %75 = tpu.matmul %73, %74, %cst_37 {dimension_numbers = #tpu.dot_dimension_numbers<[1], [0], [0], [1], [0, 0, 1, 1], [], []>} : vector<8x32xbf16>, vector<32x128xbf16>, vector<8x128xf32> -> vector<8x128xf32>
      %c0_38 = arith.constant 0 : index
      %c0_39 = arith.constant 0 : index
      %76 = vector.load %arg11[%c0_38, %c0_39] : memref<1x128xf32, #tpu.memory_space<vmem>>, vector<1x128xf32>
      %77 = vector.broadcast %76 : vector<1x128xf32> to vector<8x128xf32>
      %78 = arith.addf %75, %77 : vector<8x128xf32>
      %cst_40 = arith.constant 0.000000e+00 : f32
      %79 = vector.broadcast %cst_40 : f32 to vector<8x128xf32>
      %80 = arith.maximumf %78, %79 : vector<8x128xf32>
      %81 = arith.truncf %80 : vector<8x128xf32> to vector<8x128xbf16>
      %c0_41 = arith.constant 0 : index
      %c0_42 = arith.constant 0 : index
      %82 = vector.load %arg12[%c0_41, %c0_42] : memref<128x32xbf16, #tpu.memory_space<vmem>>, vector<128x32xbf16>
      %cst_43 = arith.constant dense<0.000000e+00> : vector<8x32xf32>
      %83 = tpu.matmul %81, %82, %cst_43 {dimension_numbers = #tpu.dot_dimension_numbers<[1], [0], [0], [1], [0, 0, 1, 1], [], []>} : vector<8x128xbf16>, vector<128x32xbf16>, vector<8x32xf32> -> vector<8x32xf32>
      %c0_44 = arith.constant 0 : index
      %c0_45 = arith.constant 0 : index
      %84 = vector.load %arg13[%c0_44, %c0_45] : memref<1x32xf32, #tpu.memory_space<vmem>>, vector<1x32xf32>
      %85 = vector.broadcast %84 : vector<1x32xf32> to vector<8x32xf32>
      %86 = arith.addf %83, %85 : vector<8x32xf32>
      %87 = arith.addf %48, %86 : vector<8x32xf32>
      %c0_46 = arith.constant 0 : index
      %c0_47 = arith.constant 0 : index
      %c0_48 = arith.constant 0 : index
      %88 = vector.load %arg14[%c0_46, %c0_47, %c0_48] : memref<1x8x32xf32, #tpu.memory_space<vmem>>, vector<1x8x32xf32>
      %89 = vector.shape_cast %88 : vector<1x8x32xf32> to vector<8x32xf32>
      %90 = vector.shape_cast %87 : vector<8x32xf32> to vector<1x8x32xf32>
      tpu.vector_store %arg14[%c0_46, %c0_47, %c0_48], %90 {strides = array<i32>} : memref<1x8x32xf32, #tpu.memory_space<vmem>>, vector<1x8x32xf32>,
    } else {
    }
    return
  }
  func.func @transform_0(%arg0: i32, %arg1: i32) -> (i32, i32, i32) {
    %c0_i32 = arith.constant 0 : i32
    %c0_i32_0 = arith.constant 0 : i32
    %c0_i32_1 = arith.constant 0 : i32
    return %arg0, %c0_i32, %c0_i32_0 : i32, i32, i32
  }
  func.func @transform_1(%arg0: i32, %arg1: i32) -> (i32, i32) {
    %c0_i32 = arith.constant 0 : i32
    %c0_i32_0 = arith.constant 0 : i32
    %c0_i32_1 = arith.constant 0 : i32
    return %c0_i32, %c0_i32_0 : i32, i32
  }
  func.func @transform_2(%arg0: i32, %arg1: i32) -> (i32, i32) {
    %c0_i32 = arith.constant 0 : i32
    %c0_i32_0 = arith.constant 0 : i32
    %c0_i32_1 = arith.constant 0 : i32
    return %c0_i32, %c0_i32_0 : i32, i32
  }
  func.func @transform_3(%arg0: i32, %arg1: i32) -> (i32, i32, i32) {
    %c0_i32 = arith.constant 0 : i32
    %c0_i32_0 = arith.constant 0 : i32
    %c0_i32_1 = arith.constant 0 : i32
    return %arg1, %c0_i32, %c0_i32_0 : i32, i32, i32
  }
  func.func @transform_4(%arg0: i32, %arg1: i32) -> (i32, i32, i32) {
    %c0_i32 = arith.constant 0 : i32
    %c0_i32_0 = arith.constant 0 : i32
    %c0_i32_1 = arith.constant 0 : i32
    return %arg1, %c0_i32, %c0_i32_0 : i32, i32, i32
  }
  func.func @transform_5(%arg0: i32, %arg1: i32) -> (i32, i32) {
    %c0_i32 = arith.constant 0 : i32
    %c0_i32_0 = arith.constant 0 : i32
    %c0_i32_1 = arith.constant 0 : i32
    return %c0_i32, %c0_i32_0 : i32, i32
  }
  func.func @transform_6(%arg0: i32, %arg1: i32) -> (i32, i32) {
    %c0_i32 = arith.constant 0 : i32
    %c0_i32_0 = arith.constant 0 : i32
    %c0_i32_1 = arith.constant 0 : i32
    return %c0_i32, %c0_i32_0 : i32, i32
  }
  func.func @transform_7(%arg0: i32, %arg1: i32) -> (i32, i32) {
    %c0_i32 = arith.constant 0 : i32
    %c0_i32_0 = arith.constant 0 : i32
    %c0_i32_1 = arith.constant 0 : i32
    return %c0_i32, %c0_i32_0 : i32, i32
  }
  func.func @transform_8(%arg0: i32, %arg1: i32) -> (i32, i32) {
    %c0_i32 = arith.constant 0 : i32
    %c0_i32_0 = arith.constant 0 : i32
    %c0_i32_1 = arith.constant 0 : i32
    return %c0_i32, %c0_i32_0 : i32, i32
  }
  func.func @transform_9(%arg0: i32, %arg1: i32) -> (i32, i32) {
    %c0_i32 = arith.constant 0 : i32
    %c0_i32_0 = arith.constant 0 : i32
    %c0_i32_1 = arith.constant 0 : i32
    return %c0_i32, %c0_i32_0 : i32, i32
  }
  func.func @transform_10(%arg0: i32, %arg1: i32) -> (i32, i32) {
    %c0_i32 = arith.constant 0 : i32
    %c0_i32_0 = arith.constant 0 : i32
    %c0_i32_1 = arith.constant 0 : i32
    return %c0_i32, %c0_i32_0 : i32, i32
  }
  func.func @transform_11(%arg0: i32, %arg1: i32) -> (i32, i32) {
    %c0_i32 = arith.constant 0 : i32
    %c0_i32_0 = arith.constant 0 : i32
    %c0_i32_1 = arith.constant 0 : i32
    return %c0_i32, %c0_i32_0 : i32, i32
  }
  func.func @transform_12(%arg0: i32, %arg1: i32) -> (i32, i32, i32) {
    %c0_i32 = arith.constant 0 : i32
    %c0_i32_0 = arith.constant 0 : i32
    %c0_i32_1 = arith.constant 0 : i32
    return %arg0, %c0_i32, %c0_i32_0 : i32, i32, i32
  }
}

</mosaic_0001>

<bundles_post_ra>
// kernel: tpu_custom_call.1
= control target key start
LH: loop header
LB: loop body
LE: loop exit
PB: predicated region body
PF: predicated region fallthrough
CT: control target
= control target key end

     0   :  { %s1680_s0 = inlined_call_operand.vmem [shape: f32[2,8,32], index: 0, kind: input, shape index: {}]   ;;  %s1681_s1 = inlined_call_operand.vmem [shape: f32[1,32], index: 1, kind: input, shape index: {}]   ;;  %s1682_s2 = inlined_call_operand.vmem [shape: f32[1,32], index: 2, kind: input, shape index: {}]   ;;  %s1683_s3 = inlined_call_operand.vmem [shape: bf16[4,32,24], index: 3, kind: input, shape index: {}]   ;;  %s1684_s4 = inlined_call_operand.vmem [shape: bf16[4,8,32], index: 4, kind: input, shape index: {}]   ;;  %s1685_s5 = inlined_call_operand.vmem [shape: f32[1,32], index: 5, kind: input, shape index: {}]   ;;  %s1686_s6 = inlined_call_operand.vmem [shape: f32[1,32], index: 6, kind: input, shape index: {}]   ;;  %s1687_s7 = inlined_call_operand.vmem [shape: f32[1,32], index: 7, kind: input, shape index: {}]   ;;  %s1688_s8 = inlined_call_operand.vmem [shape: bf16[32,128], index: 8, kind: input, shape index: {}]   ;;  %s1689_s9 = inlined_call_operand.vmem [shape: f32[1,128], index: 9, kind: input, shape index: {}]   ;;  %s1690_s10 = inlined_call_operand.vmem [shape: bf16[128,32], index: 10, kind: input, shape index: {}]   ;;  %s1691_s11 = inlined_call_operand.vmem [shape: f32[1,32], index: 11, kind: input, shape index: {}]   ;;  %s1692_s12 = inlined_call_operand.hbm [shape: f32[2,8,32], index: 12, kind: output, shape index: {}]  }
   0x1   :  { %1705 = sst [smem:[#allocation17_spill]] %s1692_s12 }
   0x2   :  { %17 = vsyncpa [#allocation5], 0 }
   0x3   :  { %19 = vsyncpa [#allocation5 + $0x1], 0  ;;  %s1446_s21 = smov 0   ;;  %s1448_s22 = smov 0  }
   0x4   :  { %s1450_s23 = smov 0   ;;  %s1452_s24 = smov 0  }
   0x5   :  { %s1454_s25 = smov 0   ;;  %s1456_s26 = smov 0  }
   0x6   :  { %s1458_s27 = smov 0   ;;  %s1460_s28 = smov 0  }
   0x7 LB: > { %1706 = sst [smem:[#allocation7_spill]] %s1343_s21  ;;  %s1063_s29 = sadd.s32 4294967295, %s1371_s28   ;;  %s1371_s28 = sphi %s1460_s28, %s25_s28   ;;  %s1367_s27 = sphi %s1458_s27, %s1729_s27   ;;  %s1363_s26 = sphi %s1456_s26, %s1732_s26   ;;  %s1359_s25 = sphi %s1454_s25, %s1727_s25   ;;  %s1355_s24 = sphi %s1452_s24, %s1726_s24   ;;  %s1351_s23 = sphi %s1450_s23, %s1725_s23   ;;  %s1347_s22 = sphi %s1448_s22, %s1731_s22   ;;  %s1343_s21 = sphi %s1446_s21, %s1730_s21  }
   0x8   : > { %1707 = sst [smem:[#allocation8_spill]] %s1351_s23  ;;  %s1064_s30 = sadd.s32 4294967294, %s1371_s28  }
   0x9   : > { %1708 = sst [smem:[#allocation9_spill]] %s1363_s26  ;;  %s34_s13 = sadd.s32 1, %s1363_s26 }
   0xa   : > { %1709 = sst [smem:[#allocation10_spill]] %s1367_s27  ;;  %p35_p0 = scmp.ge.s32.totalorder %s34_s13, 4 }
   0xb   : > { %1710 = sst [smem:[#allocation11_spill]] %s1371_s28  ;;  %s37_s14 = sadd.s32 1, %s1367_s27 }
   0xc   : > { %p321_p1 = scmp.ne.s32.totalorder %s1351_s23, %s1347_s22  ;;  %p322_p2 = scmp.eq.s32.totalorder %s1063_s29, 7 }
   0xd   : > { %s1734_s13 = smov (%p35_p0, %s34_s13), 0  ;;  %s1736_s14 = smov (!%p35_p0, %s37_s14), %s1367_s27 }
   0xe   : > { %1711 = sst [smem:[#allocation12_spill]] %s1734_s13  ;;  %p1495_p3 = por %p322_p2, %p321_p1 }
   0xf   : > { %p327_p4 = scmp.ne.s32.totalorder %s1347_s22, %s1343_s21  ;;  %p39_p5 = scmp.ge.s32.totalorder %s1736_s14, 2 }
  0x10   : > { %s1712_s15 = scalar_select %p1495_p3, 1, 0 }
  0x11   : > { %p328_p6 = scmp.eq.s32.totalorder %s1064_s30, 7  ;;  %p1067_p7 = scmp.ge.s32.totalorder %s1371_s28, 1 }
  0x12   : > { %1713 = sst [smem:[#allocation13_spill]] %s1712_s15  ;;  %p395_p8 = scmp.lt.s32.totalorder %s1371_s28, 9 }
  0x13   : > { %s1738_s14 = smov (%p39_p5, %s1736_s14), 0  ;;  %p1505_p9 = por %p328_p6, %p327_p4 }
  0x14   : > { %1714 = sst [smem:[#allocation14_spill]] %s1738_s14  ;;  %p396_p10 = pnand %p1067_p7, %p395_p8 }
  0x15   : > { %s1715_s16 = scalar_select %p1505_p9, 1, 0 }
  0x16   : > { %s308_s17 = ssub.s32 %s1367_s27, %s1738_s14  ;;  %s311_s18 = sadd.s32 1, %s1351_s23 }
  0x17   : > { %1716 = sst [smem:[#allocation15_spill]] %s1715_s16  ;;  %p309_p11 = scmp.eq.s32.totalorder %s308_s17, 0 }
  0x18   : > { %399 = sbr.rel (%p396_p10) target bundleno = 2441 (0x989), region = 68  ;;  %s1701_s20 = sand.u32 (!%p396_p10), 1, %s1347_s22  }
  0x19   : > { %s1513_s19 = scalar_select %p309_p11, %s1351_s23, %s311_s18  }
  0x1a   : > { %p445_p12 = scmp.lt.s32.totalorder (!%p396_p10), %s1359_s25, 1  ;;  %s1519_s29 = sshll.u32 (!%p396_p10), %s1701_s20, 3 }
  0x1b   : > { %1717 = sst [smem:[#allocation16_spill]] %s1513_s19  ;;  %p449_p13 = scmp.lt.s32.totalorder (!%p396_p10), %s1355_s24, 3 }
  0x1c   : > { %s444_s15 = scalar_lea.vmem (!%p396_p10), [#allocation4], %s1519_s29  ;;  %p1073_p0 = scmp.ne.s32.totalorder (!%p396_p10), %s1355_s24, 0 }
  0x1f   : > { %s446_s30 = scalar_select %p445_p12, %s1359_s25, 1 }
  0x20   : > { %s450_s14 = scalar_select %p449_p13, %s1355_s24, 3 }
  0x21   : > { %s1069_s13 = sshll.u32 %s446_s30, 3  ;;  %462 = sbr.rel (%p1073_p0) target bundleno = 350 (0x15e), region = 72  ;;  %vm466_vm0 = vcmask (!%p1073_p0), 261120   ;;  %v1373_v2 = vmov (!%p1073_p0), 0.0   ;;  %v1074_v12 = vld [vmem:[%s1681_s1] ss:$0 sm:$0xff] (!%p1073_p0) }
  0x22   : > { %s1527_s27 = scalar_lea.vmem %s1680_s0, %s1069_s13  ;;  %s1103_s26 = sshll.u32 %s450_s14, 4  ;;  %496 = vst.msk [vmem:[#allocation3] sm:$0xff] (!%p1073_p0), %vm466_vm0, %v1373_v2  ;;  %v1075_v14 = vld [vmem:[%s1682_s2] ss:$0 sm:$0xff] (!%p1073_p0) }
  0x23   : > { %s1532_s16 = scalar_lea.vmem %s1683_s3, %s1103_s26  ;;  %s1072_s21 = sshll.u32 %s450_s14, 2  ;;  %v463_v0 = vld [vmem:[%s1527_s27] sm:$0xff] (!%p1073_p0) }
  0x24   : > { %s1537_s12 = scalar_lea.vmem %s1684_s4, %s1072_s21  ;;  %v467_v1 = vsel (!%p1073_p0), %vm466_vm0, %v463_v0, 0.0 }
  0x25   : > { %468 = vadd.xlane.f32.xlu0 (!%p1073_p0), %v467_v1 }
  0xb2   : > { %v469_v3 = vpop.xlane.xlu0 %468 }
  0xb3   : > { %v471_v4 = vmul.f32 0.03125, %v469_v3 }
  0xb5   : > { %v472_v5 = vsub.f32 %v463_v0, %v471_v4 }
  0xb7   : > { %v473_v6 = vmul.f32 %v472_v5, %v472_v5 }
  0xb9   : > { %v474_v7 = vsel %vm466_vm0, %v473_v6, 0.0 }
  0xba   : > { %475 = vadd.xlane.f32.xlu0 %v474_v7 }
 0x147   : > { %v476_v8 = vpop.xlane.xlu0 %475 }
 0x148   : > { %v477_v9 = vmul.f32 0.03125, %v476_v8 }
 0x14a   : > { %v478_v10 = vadd.f32 1e-05, %v477_v9 }
 0x14c   : > { %1257 = vrsqrt.f32 %v478_v10 }
 0x156   : > { %v1258_v11 = vpop.eup %1257 }
 0x157   : > { %v480_v13 = vmul.f32 %v1258_v11, %v472_v5 }
 0x159   : > { %v487_v15 = vmul.f32 %v1074_v12, %v480_v13 }
 0x15b   : > { %v494_v16 = vadd.f32 %v1075_v14, %v487_v15 }
 0x15d   : > { %495 = vst.msk [vmem:[#allocation2] sm:$0xff] %vm466_vm0, %v494_v16 }
 0x15e PF: > { %v1259_v17 = vld [vmem:[%s1532_s16] sm:$0xff]   ;;  %v1374_v18 = vmov 0.0   ;;  %v1260_v19 = vld [vmem:[%s1532_s16 + $0x8] sm:$0xff]   ;;  %vm1375_vm1 = vmmov 0   ;;  %vm515_vm2 = vcmask 261120   ;;  %s1376_s13 = smov 120   ;;  %v610_v29 = vlaneseq }
 0x15f   : > { %1125 = vmatprep.subr.bf16.mxu0 %v1374_v18  ;;  %1133 = vmatprep.subr.bf16.mxu1 %v1374_v18  ;;  %vm563_vm3 = vcmask 64512   ;;  %s1377_s14 = smov 112   ;;  %vm633_vm5 = vcmask 1043456   ;;  %v679_v43 = vld [vmem:[%s1537_s12] sm:$0xf]  ;;  %v677_v56 = vld [vmem:[#allocation3] sm:$0xff] }
 0x160   : > { %1126 = vmatpush3.bf16.msra.mxu0 %v1259_v17  ;;  %1129 = vmatprep.mubr.msk.bf16.mxu0 %vm1375_vm1, %v1374_v18  ;;  %v611_v30 = vshrl.u32 %v610_v29, 7  ;;  %v613_v31 = vand.u32 127, %v610_v29  ;;  %v684_v44 = vsel %vm633_vm5, %v679_v43, 0  ;;  %p1082_p1 = scmp.ne.s32.totalorder %s1355_s24, 3 }
 0x161   : > { %1127 = vmatprep.subr.bf16.mxu0 %v1374_v18  ;;  %1135 = vmatprep.mubr.msk.bf16.mxu1 %vm1375_vm1, %v1374_v18  ;;  %v732_v62 = vld [vmem:[%s1527_s27] sm:$0xff] (!%p1082_p1)  ;;  %v1378_v10 = vmov (!%p1082_p1), 0.0   ;;  %vm1379_vm6 = vmmov (!%p1082_p1), 0   ;;  %v1266_v11 = vld [vmem:[%s1688_s8 + $0x8] sm:$0xff] (!%p1082_p1)   ;;  %v1269_v14 = vld [vmem:[%s1690_s10 + $0x10] sm:$0xff] (!%p1082_p1)  }
 0x162   : > { %vm614_vm4 = vcmp.ge.s32.totalorder %v611_v30, %v613_v31  ;;  %v1083_v0 = vld [vmem:[%s1685_s5] ss:$0 sm:$0xff] (!%p1082_p1)  ;;  %v1268_v13 = vld [vmem:[%s1690_s10 + $0x8] sm:$0xff] (!%p1082_p1)   ;;  %v1270_v15 = vld [vmem:[%s1690_s10 + $0x18] sm:$0xff] (!%p1082_p1)  }
 0x163   : > { %v1265_v9 = vld [vmem:[%s1688_s8] sm:$0xff] (!%p1082_p1)   ;;  %v1272_v17 = vld [vmem:[%s1690_s10 + $0x28] sm:$0xff] (!%p1082_p1)   ;;  %v1274_v29 = vld [vmem:[%s1690_s10 + $0x38] sm:$0xff] (!%p1082_p1)  }
 0x164   : > { %v497_v20 = vld [vmem:[#allocation2] sm:$0xff]  ;;  %1128 = vmatpush3.bf16.msra.mxu0 %v1260_v19 }
 0x165   : > { %v498_v21 = vpack.c.bf16 %v497_v20, %v497_v20  ;;  %1139 = vmatprep.subr.bf16.mxu0 %v1374_v18  ;;  %v1267_v12 = vld [vmem:[%s1690_s10] sm:$0xff] (!%p1082_p1)  }
 0x166   : > { %v1271_v16 = vld [vmem:[%s1690_s10 + $0x20] sm:$0xff] (!%p1082_p1)  }
 0x167   : > { %1130 = vmatmul.mubr.msk.bf16.vlgmr.msra.gmra.mrb[0].mxu0 %vm515_vm2, %v498_v21  ;;  %v1086_v30 = vld [vmem:[%s1689_s9] ss:$0 sm:$0xff] (!%p1082_p1) }
 0x168   : > { %1141 = vmatprep.mubr.msk.bf16.mxu0 %vm1375_vm1, %v1374_v18 }
 0x23a   : > { %v553_v22 = vpop.f32.mrb[0].mxu0 }
 0x23b   : > { %v559_v23 = vpack.c.bf16 %v553_v22, %v553_v22  ;;  %v1131_v24 = vpop.f32.mrb[1].mxu0  ;;  %v1084_v22 = vld [vmem:[%s1686_s6] ss:$0 sm:$0xff] (!%p1082_p1) }
 0x23c   : > { %v556_v25 = vpop.f32.mrb[2].mxu0  ;;  %v1085_v24 = vld [vmem:[%s1687_s7] ss:$0 sm:$0xff] (!%p1082_p1) }
 0x23d   : > { %561 = vrot.lane.b32.xlu0 %v559_v23, %s1376_s13  ;;  %v1132_v26 = vpop.f32.mrb[3].mxu0 }
 0x2af   : > { %v562_v27 = vpop.permute.xlu0 %561 }
 0x2b0   : > { %v568_v28 = vsel %vm563_vm3, %v562_v27, 0 }
 0x2b1   : > { %1134 = vmatpush3.bf16.xpose.msra.mxu1 %v568_v28  ;;  %v1273_v28 = vld [vmem:[%s1690_s10 + $0x30] sm:$0xff] (!%p1082_p1)  }
 0x2b2   : > { %1145 = vmatprep.subr.bf16.mxu1 %v1374_v18 }
 0x2b8   : > { %1136 = vmatmul.mubr.msk.bf16.vlgmr.msra.gmra.mrb[0].mxu1 %vm563_vm3, %v559_v23 }
 0x2b9   : > { %1147 = vmatprep.mubr.msk.bf16.mxu1 %vm1375_vm1, %v1374_v18  ;;  %1146 = vmatpush3.bf16.msra.mxu1 %v684_v44 }
 0x2ba   : > { %1159 = vmatprep.subr.bf16.mxu1 (!%p1082_p1), %v1378_v10 }
 0x38b   : > { %v604_v32 = vpop.f32.mrb[0].mxu1 }
 0x38c   : > { %v615_v33 = vsel %vm614_vm4, %v604_v32, -1e+30  ;;  %v1137_v34 = vpop.f32.mrb[1].mxu1 }
 0x38d   : > { %v607_v35 = vpop.f32.mrb[2].mxu1  ;;  %v616_v36 = vsel %vm563_vm3, %v615_v33, -inf }
 0x38e   : > { %617 = vmax.xlane.f32.xlu0 %v616_v36  ;;  %v1138_v37 = vpop.f32.mrb[3].mxu1 }
 0x41b   : > { %v618_v38 = vpop.xlane.xlu0 %617 }
 0x41c   : > { %v619_v39 = vsub.f32 %v615_v33, %v618_v38  ;;  %v1090_v38 = vld [vmem:[%s1691_s11] ss:$0 sm:$0xff] (!%p1082_p1) }
 0x41e   : > { %v620_v40 = vmul.f32 1.442695, %v619_v39 }
 0x420   : > { %1261 = vpow2.f32 %v620_v40 }
 0x42a   : > { %v1262_v41 = vpop.eup %1261 }
 0x42b   : > { %v622_v42 = vsel %vm563_vm3, %v1262_v41, 0.0 }
 0x42c   : > { %623 = vadd.xlane.f32.xlu1 %v622_v42 }
 0x43d   : > { %628 = vrot.lane.b32.xlu1 %v559_v23, %s1377_s14 }
 0x4b9   : > { %v624_v45 = vpop.xlane.xlu1 %623 }
 0x4ba   : > { %1263 = vrcp.f32 %v624_v45 }
 0x4bd   : > { %v629_v46 = vpop.permute.xlu1 %628 }
 0x4be   : > { %v635_v47 = vsel %vm633_vm5, %v629_v46, 0 }
 0x4bf   : > { %1140 = vmatpush3.bf16.msra.mxu0 %v635_v47 }
 0x4c0   : > { %1151 = vmatprep.subr.bf16.mxu0 (!%p1082_p1), %v1378_v10 }
 0x4c4   : > { %v1264_v48 = vpop.eup %1263 }
 0x4c5   : > { %v626_v49 = vmul.f32 %v1264_v48, %v1262_v41 }
 0x4c7   : > { %v627_v50 = vpack.c.bf16 %v626_v49, %v626_v49 }
 0x4c9   : > { %1142 = vmatmul.mubr.msk.bf16.vlgmr.msra.gmra.mrb[4].mxu0 %vm563_vm3, %v627_v50 }
 0x4ca   : > { %1155 = vmatprep.mubr.msk.bf16.mxu0 (!%p1082_p1), %vm1379_vm6, %v1378_v10  ;;  %1152 = vmatpush3.bf16.msra.mxu0 (!%p1082_p1), %v1265_v9 }
 0x4cb   : > { %1153 = vmatprep.subr.bf16.mxu0 (!%p1082_p1), %v1378_v10 }
 0x4ce   : > { %1154 = vmatpush3.bf16.msra.mxu0 (!%p1082_p1), %v1266_v11 }
 0x59c   : > { %v671_v51 = vpop.f32.mrb[4].mxu0 }
 0x59d   : > { %v678_v52 = vpack.c.bf16 %v671_v51, %v671_v51  ;;  %v1143_v53 = vpop.f32.mrb[5].mxu0 }
 0x59e   : > { %v674_v54 = vpop.f32.mrb[6].mxu0 }
 0x59f   : > { %v1144_v55 = vpop.f32.mrb[7].mxu0  ;;  %1148 = vmatmul.mubr.msk.bf16.vlgmr.msra.gmra.mrb[4].mxu1 %vm563_vm3, %v678_v52 }
 0x5a0   : > { %1175 = vmatprep.mubr.msk.bf16.mxu1 (!%p1082_p1), %vm1379_vm6, %v1378_v10  ;;  %1160 = vmatpush3.bf16.msra.mxu1 (!%p1082_p1), %v1267_v12 }
 0x5a1   : > { %1161 = vmatprep.subr.bf16.mxu1 (!%p1082_p1), %v1378_v10 }
 0x5a4   : > { %1162 = vmatpush3.bf16.msra.mxu1 (!%p1082_p1), %v1268_v13 }
 0x5a5   : > { %1163 = vmatprep.subr.bf16.mxu1 (!%p1082_p1), %v1378_v10 }
 0x5a8   : > { %1164 = vmatpush3.bf16.msra.mxu1 (!%p1082_p1), %v1269_v14 }
 0x5a9   : > { %1165 = vmatprep.subr.bf16.mxu1 (!%p1082_p1), %v1378_v10 }
 0x5ac   : > { %1166 = vmatpush3.bf16.msra.mxu1 (!%p1082_p1), %v1270_v15 }
 0x5ad   : > { %1167 = vmatprep.subr.bf16.mxu1 (!%p1082_p1), %v1378_v10 }
 0x5b0   : > { %1168 = vmatpush3.bf16.msra.mxu1 (!%p1082_p1), %v1271_v16 }
 0x5b1   : > { %1169 = vmatprep.subr.bf16.mxu1 (!%p1082_p1), %v1378_v10 }
 0x5b4   : > { %1170 = vmatpush3.bf16.msra.mxu1 (!%p1082_p1), %v1272_v17 }
 0x5b5   : > { %1171 = vmatprep.subr.bf16.mxu1 (!%p1082_p1), %v1378_v10 }
 0x5b8   : > { %1172 = vmatpush3.bf16.msra.mxu1 (!%p1082_p1), %v1273_v28 }
 0x5b9   : > { %1173 = vmatprep.subr.bf16.mxu1 (!%p1082_p1), %v1378_v10 }
 0x5bc   : > { %1174 = vmatpush3.bf16.msra.mxu1 (!%p1082_p1), %v1274_v29 }
 0x66f   : > { %731 = sbr.rel (%p1082_p1) target bundleno = 2415 (0x96f), region = 76 }
 0x672   : > { %v720_v57 = vpop.f32.mrb[4].mxu1 }
 0x673   : > { %v726_v58 = vadd.f32 %v720_v57, %v677_v56  ;;  %v1149_v59 = vpop.f32.mrb[5].mxu1 }
 0x674   : > { %v723_v60 = vpop.f32.mrb[6].mxu1 }
 0x675   : > { %727 = vst.msk [vmem:[#allocation3] sm:$0xff] %vm515_vm2, %v726_v58  ;;  %v1150_v61 = vpop.f32.mrb[7].mxu1 }
 0x67c   : > { %v733_v63 = vld [vmem:[#allocation3] sm:$0xff] }
 0x67d   : > { %v734_v1 = vadd.f32 %v733_v63, %v732_v62 }
 0x67f   : > { %v1572_v2 = vadd.f32 %v1083_v0, %v734_v1 }
 0x681   : > { %v745_v3 = vsel %vm515_vm2, %v1572_v2, 0.0 }
 0x682   : > { %746 = vadd.xlane.f32.xlu0 %v745_v3 }
 0x70f   : > { %v747_v4 = vpop.xlane.xlu0 %746 }
 0x710   : > { %v749_v5 = vmul.f32 0.03125, %v747_v4 }
 0x712   : > { %v750_v6 = vsub.f32 %v1572_v2, %v749_v5 }
 0x714   : > { %v751_v7 = vmul.f32 %v750_v6, %v750_v6 }
 0x716   : > { %v752_v8 = vsel %vm515_vm2, %v751_v7, 0.0 }
 0x717   : > { %753 = vadd.xlane.f32.xlu0 %v752_v8 }
 0x7a4   : > { %v754_v18 = vpop.xlane.xlu0 %753 }
 0x7a5   : > { %v755_v19 = vmul.f32 0.03125, %v754_v18 }
 0x7a7   : > { %v756_v20 = vadd.f32 1e-05, %v755_v19 }
 0x7a9   : > { %1275 = vrsqrt.f32 %v756_v20 }
 0x7b3   : > { %v1276_v21 = vpop.eup %1275 }
 0x7b4   : > { %v758_v23 = vmul.f32 %v1276_v21, %v750_v6 }
 0x7b6   : > { %v765_v25 = vmul.f32 %v1084_v22, %v758_v23 }
 0x7b8   : > { %v772_v26 = vadd.f32 %v1085_v24, %v765_v25 }
 0x7ba   : > { %v773_v27 = vpack.c.bf16 %v772_v26, %v772_v26 }
 0x7bc   : > { %1156 = vmatmul.mubr.msk.bf16.vlgmr.msra.gmra.mrb[0].mxu0 %vm515_vm2, %v773_v27 }
 0x88f   : > { %v834_v31 = vpop.f32.mrb[0].mxu0 }
 0x890   : > { %v835_v32 = vadd.f32 %v1086_v30, %v834_v31  ;;  %v1157_v33 = vpop.f32.mrb[1].mxu0 }
 0x891   : > { %v837_v34 = vpop.f32.mrb[2].mxu0 }
 0x892   : > { %v840_v35 = vmax.f32 %v835_v32, 0.0  ;;  %v1158_v36 = vpop.f32.mrb[3].mxu0 }
 0x894   : > { %v841_v37 = vpack.c.bf16 %v840_v35, %v840_v35 }
 0x896   : > { %1176 = vmatmul.mubr.bf16.vlgmr.msra.gmra.mrb[0].mxu1 %v841_v37 }
 0x969   : > { %v947_v39 = vpop.f32.mrb[0].mxu1 }
 0x96a   : > { %v948_v40 = vadd.f32 %v1090_v38, %v947_v39  ;;  %v1177_v41 = vpop.f32.mrb[1].mxu1 }
 0x96b   : > { %v950_v42 = vpop.f32.mrb[2].mxu1 }
 0x96c   : > { %v953_v43 = vadd.f32 %v948_v40, %v1572_v2  ;;  %v1178_v44 = vpop.f32.mrb[3].mxu1 }
 0x96e   : > { %954 = vst.msk [vmem:[%s444_s15] sm:$0xff] %vm515_vm2, %v953_v43 }
 0x96f PF: > { %s1100_s16 = sshll.u32 %s1359_s25, 7  ;;  %s1719_s19 = sld [smem:[#allocation17_spill]] }
 0x970   : > { %s969_s30 = sshll.u32 %s444_s15, 4  ;;  %s1720_s17 = sand.u32 1, %s1347_s22   ;;  %s970_s30 = int_to_ptr.vmem [resolvable:$true] %s969_s30 }
 0x971   : > { %s956_s18 = scalar_lea.sflag [#allocation5], %s1720_s17  ;;  %s1277_s21 = scalar_lea.vmem %s970_s30, 128 }
 0x972   : > { %p1278_p2 = scmp.ne.s32.totalorder %s970_s30, %s1277_s21  ;;  %s1380_s23 = smov [#allocation4]  }
 0x973   : > { %s1281_s26 = sshll.u32 %s1380_s23, 4  ;;  %s1282_s26 = int_to_ptr.vmem [resolvable:$false] %s1281_s26 }
 0x974   : > { %p1279_p4 = pnand %p1278_p2, %p1495_p3  ;;  %s1283_s28 = scalar_lea.vmem %s1282_s26, 256 }
 0x975   : > { %s1629_s20 = scalar_lea.hbm %s1719_s19, %s1100_s16  ;;  %p1284_p6 = scmp.lt.s32.totalorder %s970_s30, %s1282_s26 }
 0x976   : > { %p1280_p5 = pneg %p1279_p4  ;;  %p1285_p7 = scmp.lt.s32.totalorder %s1283_s28, %s1277_s21 }
 0x978   : > { %p1286_p8 = por %p1285_p7, %p1284_p6 }
 0x97a   : > { %p1287_p10 = pnand %p1286_p8, %p1280_p5 }
 0x97c   : > { %1290 = shalt.err (!%p1287_p10)
}
 0x97d   : > { %s1291_s25 = scalar_lea.hbm %s1629_s20, 128  ;;  %s1295_s13 = scalar_lea.hbm %s1719_s19, 256 }
 0x97e   : > { %p1292_p11 = scmp.ne.s32.totalorder %s1629_s20, %s1291_s25  ;;  %p1296_p0 = scmp.lt.u32.totalorder %s1629_s20, %s1719_s19 }
 0x97f   : > { %p1297_p1 = scmp.lt.u32.totalorder %s1295_s13, %s1291_s25  ;;  %p1299_p4 = scmp.lt.u32.totalorder %s1291_s25, %s1629_s20 }
 0x980   : > { %p1293_p12 = pnand %p1292_p11, %p1495_p3 }
 0x981   : > { %p1298_p2 = por %p1297_p1, %p1296_p0 }
 0x982   : > { %p1294_p13 = pneg %p1293_p12 }
 0x983   : > { %p1300_p5 = por %p1299_p4, %p1298_p2 }
 0x985   : > { %p1301_p6 = pnand %p1300_p5, %p1294_p13 }
 0x987   : > { %1304 = shalt.err (!%p1301_p6)
}
 0x988   : > { %1179 = dma.vmem_to_hbm [thread:$0]  (%p1495_p3), %s970_s30, 128, %s1629_s20, %s956_s18  }
 0x989 PF: > { %s1721_s24 = sld [smem:[#allocation11_spill]]  ;;  %s1722_s27 = sld [smem:[#allocation7_spill]] }
 0x98f   : > { %p1185_p7 = scmp.ge.s32.totalorder %s1721_s24, 2  ;;  %s981_s21 = sand.u32 1, %s1722_s27  }
 0x990   : > { %s982_s23 = scalar_lea.sflag [#allocation5], %s981_s21 }
 0x991   : > { %p1182_p8 = pnand %p1185_p7, %p1505_p9 }
 0x993   : > { %1338 = dma.done.wait (!%p1182_p8), %s982_s23, 128  }
 0x994   : > { %1340 = vsyncadd (!%p1182_p8), %s982_s23, 4294967168  ;;  %s25_s28 = sadd.s32 1, %s1721_s24   ;;  %s1724_s26 = sld [smem:[#allocation8_spill]] }
 0x995   : > { %p22_p10 = scmp.ge.s32.totalorder %s25_s28, 10   ;;  %s1725_s23 = sld [smem:[#allocation16_spill]] }
 0x996   : > { %s1726_s24 = sld [smem:[#allocation9_spill]]  ;;  %s1727_s25 = sld [smem:[#allocation10_spill]] }
 0x997   : > { %s1728_s12 = sld [smem:[#allocation12_spill]]  ;;  %s1729_s27 = sld [smem:[#allocation14_spill]] }
 0x998   : > { %s1730_s21 = smov %s1347_s22  ;;  %24 = sbr.rel (!%p22_p10) target bundleno = 7 (0x7), region = 117 }
 0x99a   : > { %s1731_s22 = smov %s1724_s26 }
 0x99d   : > { %s1732_s26 = smov %s1728_s12 }
 0x99f   :  { %987 = vsyncpa [#allocation5], 1 }
 0x9a0   :  { %989 = vsyncpa [#allocation5 + $0x1], 1 }

</bundles_post_ra>
